<compile_context>
chip_gen: v5e
topology: v5e:2x2
jax: 0.10.0
libtpu: 0.0.40
codegen_flags: <defaults>
</compile_context>

<pallas_src>
import functools

import jax
import jax.numpy as jnp
from jax.experimental import pallas as pl
from jax.experimental.pallas import tpu as pltpu


def _silu(x, approx=False):
    denom = 1.0 + jnp.exp(-x)          # exp -> EUP slot
    if approx:
        inv = pl.reciprocal(denom, approx=True)   # vrcp -> EUP slot (free-ish)
    else:
        inv = 1.0 / denom
    return x * inv


def _round_up(n, m):
    return ((n + m - 1) // m) * m


def _scorenet_kernel(x_ref, wt1_ref, bt1_ref, wfront_ref, wtime_ref,
                     b1_ref, w2_ref, b2_ref, out_ref, *, approx_silu):
    f32 = jnp.float32
    d_in = wfront_ref.shape[0]          # d_z + k (static)
    mxu_dt = wfront_ref.dtype           # f32 or bf16 (trace-time constant)

    # Packed input slab: [ z | onehot(t) | tau ] — static ref slices are free.
    zoh = x_ref[:, :d_in]               # (TB, d_z+k)  f32
    tau = x_ref[:, d_in:d_in + 1]       # (TB, 1)      f32

    # Time-MLP layer 1: K=1 matmul is a broadcast outer product -> VPU.
    # All elementwise math stays f32 (v5e has no bf16 VPU/EUP).
    ht = _silu(tau * wt1_ref[...] + bt1_ref[...], approx_silu)      # (TB, E)

    # Trunk layer 1: concat + emb lookup + time-MLP layer 2 all folded into
    # two accumulating MXU matmuls against VMEM-resident weights.
    h1 = (jnp.dot(zoh.astype(mxu_dt), wfront_ref[...],
                  preferred_element_type=f32)
          + jnp.dot(ht.astype(mxu_dt), wtime_ref[...],
                    preferred_element_type=f32)
          + b1_ref[...])                                            # (TB, hidden)
    h1 = _silu(h1, approx_silu)

    out = jnp.dot(h1.astype(mxu_dt), w2_ref[...],
                  preferred_element_type=f32) + b2_ref[...]
    out_ref[...] = out.astype(out_ref.dtype)                        # (TB, d_z)


def scorenet_forward(z, t, tau, params, *, max_batch_tile=2048,
                     use_bf16_mxu=False, approx_silu=False):
    """Pallas ScoreNet forward.

    params = (emb_table, wt1, bt1, wt2, bt2, w1, b1, w2, b2); weights in
    (in, out) layout, biases (1, out).  Returns (B, d_z).
    """
    emb_table, wt1, bt1, wt2, bt2, w1, b1, w2, b2 = params
    B, d_z = z.shape
    k, embed_dim = emb_table.shape
    f32 = jnp.float32

    # ---- wrapper-side algebra (exact f32 pre-contractions) -----------------
    w1_z = w1[:d_z]                                    # (d_z, hidden)
    w1_e = w1[d_z:d_z + embed_dim]                     # (E,   hidden)
    w1_t = w1[d_z + embed_dim:]                        # (E,   hidden)

    emb_proj = jnp.dot(emb_table.astype(f32), w1_e,
                       preferred_element_type=f32)                 # (k, hidden)
    w_front = jnp.concatenate([w1_z, emb_proj], axis=0)            # (d_z+k, hidden)
    w_time = jnp.dot(wt2, w1_t, preferred_element_type=f32)        # (E, hidden)
    b1_eff = b1 + jnp.dot(bt2, w1_t, preferred_element_type=f32)   # (1, hidden)

    mxu_dt = jnp.bfloat16 if use_bf16_mxu else f32

    # ---- pack the streamed inputs into one (B, d_z+k+1) slab ---------------
    t_oh = jax.nn.one_hot(t, k, dtype=f32)
    x = jnp.concatenate(
        [z.astype(f32), t_oh, tau.reshape(B, 1).astype(f32)], axis=-1)
    feat = d_z + k + 1

    # ---- batch tiling: near-equal, 8-aligned tiles, tile <= max_batch_tile -
    n_tiles = pl.cdiv(B, max_batch_tile)
    tb = _round_up(pl.cdiv(B, n_tiles), 8)
    b_pad = _round_up(B, tb)
    if b_pad != B:
        x = jnp.pad(x, ((0, b_pad - B), (0, 0)))
    grid = (b_pad // tb,)

    def resident(arr):
        # Whole-array block with a constant index_map -> DMA'd once, stays
        # VMEM-resident for all grid steps.
        return pl.BlockSpec(arr.shape, lambda i: (0, 0))

    weights = (wt1.astype(f32), bt1.astype(f32),
               w_front.astype(mxu_dt), w_time.astype(mxu_dt),
               b1_eff.astype(f32), w2.astype(mxu_dt), b2.astype(f32))

    kernel = functools.partial(_scorenet_kernel, approx_silu=approx_silu)

    out = pl.pallas_call(
        kernel,
        out_shape=jax.ShapeDtypeStruct((b_pad, d_z), z.dtype),
        grid_spec=pltpu.PrefetchScalarGridSpec(
            num_scalar_prefetch=0,
            grid=grid,
            in_specs=[pl.BlockSpec((tb, feat), lambda i: (i, 0))]
                     + [resident(w) for w in weights],
            out_specs=pl.BlockSpec((tb, d_z), lambda i: (i, 0)),
        ),
        compiler_params=pltpu.CompilerParams(
            dimension_semantics=("parallel",),   # megacore split where available
        ),
    )(x, *weights)

    return out[:B]


def init_params(key, d_z, k, hidden=128, embed_dim=64):
    """Parameters matching nn.Embedding + the two nn.Sequential MLPs."""
    ks = jax.random.split(key, 9)

    def lin(kw, kb, fan_in, fan_out):
        bound = 1.0 / (fan_in ** 0.5)
        w = jax.random.uniform(kw, (fan_in, fan_out), jnp.float32, -bound, bound)
        b = jax.random.uniform(kb, (1, fan_out), jnp.float32, -bound, bound)
        return w, b

    emb_table = jax.random.normal(ks[0], (k, embed_dim), jnp.float32)
    wt1, bt1 = lin(ks[1], ks[2], 1, embed_dim)
    wt2, bt2 = lin(ks[3], ks[4], embed_dim, embed_dim)
    w1, b1 = lin(ks[5], ks[6], d_z + 2 * embed_dim, hidden)
    w2, b2 = lin(ks[7], ks[8], hidden, d_z)
    return (emb_table, wt1, bt1, wt2, bt2, w1, b1, w2, b2)


def _reference(z, t, tau, params):
    """Pure-JAX reference matching the PyTorch forward exactly."""
    emb_table, wt1, bt1, wt2, bt2, w1, b1, w2, b2 = params
    B = z.shape[0]
    tau2d = tau.reshape(B, 1)
    e = emb_table[t]                                     # embedding lookup
    time_out = _silu(tau2d @ wt1 + bt1) @ wt2 + bt2      # time MLP
    h = jnp.concatenate([z, e, time_out], axis=-1)
    return _silu(h @ w1 + b1) @ w2 + b2                  # trunk


if __name__ == "__main__":
    d_z, k, hidden, embed_dim, batch = 8, 4, 128, 64, 16

    key = jax.random.PRNGKey(0)
    kz, kt, ktau, kp = jax.random.split(key, 4)
    z = jax.random.normal(kz, (batch, d_z), jnp.float32)
    t = jax.random.randint(kt, (batch,), 0, k, jnp.int32)
    tau = jax.random.uniform(ktau, (batch, 1), jnp.float32)
    params = init_params(kp, d_z, k, hidden, embed_dim)

    out = scorenet_forward(z, t, tau, params)
    jax.block_until_ready(out)

    ref = _reference(z, t, tau, params)
    assert out.shape == (batch, d_z)
    # The wt2@w1_t fusion reorders f32 summation slightly; 5e-5 covers it.
    assert jnp.allclose(out, ref, atol=5e-5, rtol=5e-5), (
        float(jnp.max(jnp.abs(out - ref))))

    print("KERNEL_OK")
</pallas_src>

<mosaic_0001>
module attributes {stable_mosaic.version = 11 : i64} {
  func.func @_scorenet_kernel(%arg0: i32, %arg1: memref<16x13xf32, #tpu.memory_space<vmem>>, %arg2: memref<1x64xf32, #tpu.memory_space<vmem>>, %arg3: memref<1x64xf32, #tpu.memory_space<vmem>>, %arg4: memref<12x128xf32, #tpu.memory_space<vmem>>, %arg5: memref<64x128xf32, #tpu.memory_space<vmem>>, %arg6: memref<1x128xf32, #tpu.memory_space<vmem>>, %arg7: memref<128x8xf32, #tpu.memory_space<vmem>>, %arg8: memref<1x8xf32, #tpu.memory_space<vmem>>, %arg9: memref<16x8xf32, #tpu.memory_space<vmem>>) attributes {dimension_semantics = [#tpu.dimension_semantics<parallel>], iteration_bounds = array<i64: 1>, scalar_prefetch = 0 : i64, scratch_operands = 0 : i64, tpu.core_type = #tpu.core_type<tc>, window_params = [{transform_indices = @transform_0, window_bounds = array<i64: 16, 13>}, {pipeline_mode = #tpu.pipeline_mode<synchronous>, transform_indices = @transform_1, window_bounds = array<i64: 1, 64>}, {pipeline_mode = #tpu.pipeline_mode<synchronous>, transform_indices = @transform_2, window_bounds = array<i64: 1, 64>}, {pipeline_mode = #tpu.pipeline_mode<synchronous>, transform_indices = @transform_3, window_bounds = array<i64: 12, 128>}, {pipeline_mode = #tpu.pipeline_mode<synchronous>, transform_indices = @transform_4, window_bounds = array<i64: 64, 128>}, {pipeline_mode = #tpu.pipeline_mode<synchronous>, transform_indices = @transform_5, window_bounds = array<i64: 1, 128>}, {pipeline_mode = #tpu.pipeline_mode<synchronous>, transform_indices = @transform_6, window_bounds = array<i64: 128, 8>}, {pipeline_mode = #tpu.pipeline_mode<synchronous>, transform_indices = @transform_7, window_bounds = array<i64: 1, 8>}, {transform_indices = @transform_8, window_bounds = array<i64: 16, 8>}]} {
    %c0 = arith.constant 0 : index
    %c0_0 = arith.constant 0 : index
    %0 = vector.load %arg1[%c0, %c0_0] : memref<16x13xf32, #tpu.memory_space<vmem>>, vector<16x12xf32>
    %c0_1 = arith.constant 0 : index
    %c12 = arith.constant 12 : index
    %1 = vector.load %arg1[%c0_1, %c12] : memref<16x13xf32, #tpu.memory_space<vmem>>, vector<16x1xf32>
    %c0_2 = arith.constant 0 : index
    %c0_3 = arith.constant 0 : index
    %2 = vector.load %arg2[%c0_2, %c0_3] : memref<1x64xf32, #tpu.memory_space<vmem>>, vector<1x64xf32>
    %3 = vector.broadcast %1 : vector<16x1xf32> to vector<16x64xf32>
    %4 = vector.broadcast %2 : vector<1x64xf32> to vector<16x64xf32>
    %5 = arith.mulf %3, %4 : vector<16x64xf32>
    %c0_4 = arith.constant 0 : index
    %c0_5 = arith.constant 0 : index
    %6 = vector.load %arg3[%c0_4, %c0_5] : memref<1x64xf32, #tpu.memory_space<vmem>>, vector<1x64xf32>
    %7 = vector.broadcast %6 : vector<1x64xf32> to vector<16x64xf32>
    %8 = arith.addf %5, %7 : vector<16x64xf32>
    %cst = arith.constant 0.000000e+00 : f32
    %9 = vector.broadcast %cst : f32 to vector<16x64xf32>
    %10 = arith.subf %9, %8 : vector<16x64xf32>
    %11 = math.exp %10 : vector<16x64xf32>
    %cst_6 = arith.constant 1.000000e+00 : f32
    %12 = vector.broadcast %cst_6 : f32 to vector<16x64xf32>
    %13 = arith.addf %12, %11 : vector<16x64xf32>
    %cst_7 = arith.constant 1.000000e+00 : f32
    %14 = vector.broadcast %cst_7 : f32 to vector<16x64xf32>
    %15 = arith.divf %14, %13 : vector<16x64xf32>
    %16 = arith.mulf %8, %15 : vector<16x64xf32>
    %c0_8 = arith.constant 0 : index
    %c0_9 = arith.constant 0 : index
    %17 = vector.load %arg4[%c0_8, %c0_9] : memref<12x128xf32, #tpu.memory_space<vmem>>, vector<12x128xf32>
    %cst_10 = arith.constant dense<0.000000e+00> : vector<16x128xf32>
    %18 = tpu.matmul %0, %17, %cst_10 {dimension_numbers = #tpu.dot_dimension_numbers<[1], [0], [0], [1], [0, 0, 1, 1], [], []>} : vector<16x12xf32>, vector<12x128xf32>, vector<16x128xf32> -> vector<16x128xf32>
    %c0_11 = arith.constant 0 : index
    %c0_12 = arith.constant 0 : index
    %19 = vector.load %arg5[%c0_11, %c0_12] : memref<64x128xf32, #tpu.memory_space<vmem>>, vector<64x128xf32>
    %cst_13 = arith.constant dense<0.000000e+00> : vector<16x128xf32>
    %20 = tpu.matmul %16, %19, %cst_13 {dimension_numbers = #tpu.dot_dimension_numbers<[1], [0], [0], [1], [0, 0, 1, 1], [], []>} : vector<16x64xf32>, vector<64x128xf32>, vector<16x128xf32> -> vector<16x128xf32>
    %21 = arith.addf %18, %20 : vector<16x128xf32>
    %c0_14 = arith.constant 0 : index
    %c0_15 = arith.constant 0 : index
    %22 = vector.load %arg6[%c0_14, %c0_15] : memref<1x128xf32, #tpu.memory_space<vmem>>, vector<1x128xf32>
    %23 = vector.broadcast %22 : vector<1x128xf32> to vector<16x128xf32>
    %24 = arith.addf %21, %23 : vector<16x128xf32>
    %cst_16 = arith.constant 0.000000e+00 : f32
    %25 = vector.broadcast %cst_16 : f32 to vector<16x128xf32>
    %26 = arith.subf %25, %24 : vector<16x128xf32>
    %27 = math.exp %26 : vector<16x128xf32>
    %cst_17 = arith.constant 1.000000e+00 : f32
    %28 = vector.broadcast %cst_17 : f32 to vector<16x128xf32>
    %29 = arith.addf %28, %27 : vector<16x128xf32>
    %cst_18 = arith.constant 1.000000e+00 : f32
    %30 = vector.broadcast %cst_18 : f32 to vector<16x128xf32>
    %31 = arith.divf %30, %29 : vector<16x128xf32>
    %32 = arith.mulf %24, %31 : vector<16x128xf32>
    %c0_19 = arith.constant 0 : index
    %c0_20 = arith.constant 0 : index
    %33 = vector.load %arg7[%c0_19, %c0_20] : memref<128x8xf32, #tpu.memory_space<vmem>>, vector<128x8xf32>
    %cst_21 = arith.constant dense<0.000000e+00> : vector<16x8xf32>
    %34 = tpu.matmul %32, %33, %cst_21 {dimension_numbers = #tpu.dot_dimension_numbers<[1], [0], [0], [1], [0, 0, 1, 1], [], []>} : vector<16x128xf32>, vector<128x8xf32>, vector<16x8xf32> -> vector<16x8xf32>
    %c0_22 = arith.constant 0 : index
    %c0_23 = arith.constant 0 : index
    %35 = vector.load %arg8[%c0_22, %c0_23] : memref<1x8xf32, #tpu.memory_space<vmem>>, vector<1x8xf32>
    %36 = vector.broadcast %35 : vector<1x8xf32> to vector<16x8xf32>
    %37 = arith.addf %34, %36 : vector<16x8xf32>
    %c0_24 = arith.constant 0 : index
    %c0_25 = arith.constant 0 : index
    %38 = vector.load %arg9[%c0_24, %c0_25] : memref<16x8xf32, #tpu.memory_space<vmem>>, vector<16x8xf32>
    tpu.vector_store %arg9[%c0_24, %c0_25], %37 {strides = array<i32>} : memref<16x8xf32, #tpu.memory_space<vmem>>, vector<16x8xf32>,
    return
  }
  func.func @transform_0(%arg0: i32) -> (i32, i32) {
    %c0_i32 = arith.constant 0 : i32
    %c0_i32_0 = arith.constant 0 : i32
    return %arg0, %c0_i32 : i32, i32
  }
  func.func @transform_1(%arg0: i32) -> (i32, i32) {
    %c0_i32 = arith.constant 0 : i32
    %c0_i32_0 = arith.constant 0 : i32
    %c0_i32_1 = arith.constant 0 : i32
    return %c0_i32, %c0_i32_0 : i32, i32
  }
  func.func @transform_2(%arg0: i32) -> (i32, i32) {
    %c0_i32 = arith.constant 0 : i32
    %c0_i32_0 = arith.constant 0 : i32
    %c0_i32_1 = arith.constant 0 : i32
    return %c0_i32, %c0_i32_0 : i32, i32
  }
  func.func @transform_3(%arg0: i32) -> (i32, i32) {
    %c0_i32 = arith.constant 0 : i32
    %c0_i32_0 = arith.constant 0 : i32
    %c0_i32_1 = arith.constant 0 : i32
    return %c0_i32, %c0_i32_0 : i32, i32
  }
  func.func @transform_4(%arg0: i32) -> (i32, i32) {
    %c0_i32 = arith.constant 0 : i32
    %c0_i32_0 = arith.constant 0 : i32
    %c0_i32_1 = arith.constant 0 : i32
    return %c0_i32, %c0_i32_0 : i32, i32
  }
  func.func @transform_5(%arg0: i32) -> (i32, i32) {
    %c0_i32 = arith.constant 0 : i32
    %c0_i32_0 = arith.constant 0 : i32
    %c0_i32_1 = arith.constant 0 : i32
    return %c0_i32, %c0_i32_0 : i32, i32
  }
  func.func @transform_6(%arg0: i32) -> (i32, i32) {
    %c0_i32 = arith.constant 0 : i32
    %c0_i32_0 = arith.constant 0 : i32
    %c0_i32_1 = arith.constant 0 : i32
    return %c0_i32, %c0_i32_0 : i32, i32
  }
  func.func @transform_7(%arg0: i32) -> (i32, i32) {
    %c0_i32 = arith.constant 0 : i32
    %c0_i32_0 = arith.constant 0 : i32
    %c0_i32_1 = arith.constant 0 : i32
    return %c0_i32, %c0_i32_0 : i32, i32
  }
  func.func @transform_8(%arg0: i32) -> (i32, i32) {
    %c0_i32 = arith.constant 0 : i32
    %c0_i32_0 = arith.constant 0 : i32
    return %arg0, %c0_i32 : i32, i32
  }
}

</mosaic_0001>

<bundles_post_ra>
// kernel: tpu_custom_call.1
= control target key start
LH: loop header
LB: loop body
LE: loop exit
PB: predicated region body
PF: predicated region fallthrough
CT: control target
= control target key end

     0   :  { %v304_v0 = vmov 12   ;;  %vm138_vm0 = vcmask 1043456   ;;  %vm133_vm1 = vcmask 97280   ;;  %vm103_vm6 = vcmask 523264   ;;  %s454_s0 = inlined_call_operand.vmem [shape: f32[16,13], index: 0, kind: input, shape index: {}]   ;;  %s455_s1 = inlined_call_operand.vmem [shape: f32[1,64], index: 1, kind: input, shape index: {}]   ;;  %s456_s2 = inlined_call_operand.vmem [shape: f32[1,64], index: 2, kind: input, shape index: {}]   ;;  %s457_s4 = inlined_call_operand.vmem [shape: f32[64,128], index: 4, kind: input, shape index: {}]   ;;  %s458_s3 = inlined_call_operand.vmem [shape: f32[12,128], index: 3, kind: input, shape index: {}]   ;;  %s459_s5 = inlined_call_operand.vmem [shape: f32[1,128], index: 5, kind: input, shape index: {}]   ;;  %s460_s7 = inlined_call_operand.vmem [shape: f32[1,8], index: 7, kind: input, shape index: {}]   ;;  %s461_s6 = inlined_call_operand.vmem [shape: f32[128,8], index: 6, kind: input, shape index: {}]   ;;  %s462_s8 = inlined_call_operand.vmem [shape: f32[16,8], index: 8, kind: output, shape index: {}]  }
   0x1   :  { %283 = vset.pattern.permute.xlu0 %v304_v0  ;;  %v29_v1 = vld [vmem:[%s454_s0] sm:$0xff]  ;;  %v30_v2 = vld [vmem:[%s454_s0 + $0x8] sm:$0xff]  ;;  %v102_v3 = vld [vmem:[%s457_s4 + $0x38] sm:$0xff] }
   0x2   :  { %34 = vperm.xlu0 %283, %v29_v1   ;;  %118 = vmatpush.msra.mxu0 %v102_v3  ;;  %v101_v4 = vld [vmem:[%s457_s4 + $0x30] sm:$0xff]  ;;  %v100_v5 = vld [vmem:[%s457_s4 + $0x28] sm:$0xff]  ;;  %v99_v6 = vld [vmem:[%s457_s4 + $0x20] sm:$0xff] }
   0x3   :  { %v98_v7 = vld [vmem:[%s457_s4 + $0x18] sm:$0xff]  ;;  %v94_v8 = vld [vmem:[%s458_s3 + $0x8] sm:$0xf]  ;;  %v93_v9 = vld [vmem:[%s458_s3] sm:$0xff] }
   0x4   :  { %119 = vmatpush.msra.mxu0 %v101_v4  ;;  %263 = vmatpush.msk.msra.mxu1 %vm138_vm0, %v94_v8  ;;  %v284_v10 = vld [vmem:[%s455_s1] ss:$0 sm:$0xff]  ;;  %v97_v11 = vld [vmem:[%s457_s4 + $0x10] sm:$0xff]  ;;  %v96_v13 = vld [vmem:[%s457_s4 + $0x8] sm:$0xff] }
   0x5   :  { %v285_v12 = vld [vmem:[%s456_s2] ss:$0 sm:$0xff]  ;;  %v226_v51 = vld [vmem:[%s461_s6 + $0x78] sm:$0xff]  ;;  %v225_v52 = vld [vmem:[%s461_s6 + $0x70] sm:$0xff] }
   0x6   :  { %120 = vmatpush.msra.mxu0 %v100_v5  ;;  %157 = vmatpush.msra.mxu1 %v93_v9  ;;  %v95_v16 = vld [vmem:[%s457_s4] sm:$0xff]  ;;  %v224_v53 = vld [vmem:[%s461_s6 + $0x68] sm:$0xff]  ;;  %v222_v55 = vld [vmem:[%s461_s6 + $0x58] sm:$0xff] }
   0x7   :  { %264 = vmatmul.msk.f32.vlgmr.msra.gmra.mxu1 %vm133_vm1, %v29_v1  ;;  %231 = vmatpush.msra.mxu2 %v226_v51  ;;  %v223_v54 = vld [vmem:[%s461_s6 + $0x60] sm:$0xff]  ;;  %v221_v56 = vld [vmem:[%s461_s6 + $0x50] sm:$0xff]  ;;  %v220_v57 = vld [vmem:[%s461_s6 + $0x48] sm:$0xff] }
   0x8   :  { %121 = vmatpush.msra.mxu0 %v99_v6  ;;  %266 = vmatpush.msra.mxu3 %v226_v51  ;;  %v219_v58 = vld [vmem:[%s461_s6 + $0x40] sm:$0xff]  ;;  %v218_v59 = vld [vmem:[%s461_s6 + $0x38] sm:$0xff]  ;;  %v217_v60 = vld [vmem:[%s461_s6 + $0x30] sm:$0xff] }
   0x9   :  { %232 = vmatpush.msra.mxu2 %v225_v52  ;;  %v216_v61 = vld [vmem:[%s461_s6 + $0x28] sm:$0xff]  ;;  %v215_v62 = vld [vmem:[%s461_s6 + $0x20] sm:$0xff]  ;;  %v214_v63 = vld [vmem:[%s461_s6 + $0x18] sm:$0xff] }
   0xa   :  { %39 = vperm.xlu0 %283, %v30_v2   ;;  %122 = vmatpush.msra.mxu0 %v98_v7  ;;  %v213_v1 = vld [vmem:[%s461_s6 + $0x10] sm:$0xff]  ;;  %v212_v3 = vld [vmem:[%s461_s6 + $0x8] sm:$0xff]  ;;  %v211_v6 = vld [vmem:[%s461_s6] sm:$0xff] }
   0xb   :  { %267 = vmatpush.msra.mxu3 %v225_v52  ;;  %233 = vmatpush.msra.mxu2 %v224_v53 }
   0xc   :  { %123 = vmatpush.msra.mxu0 %v97_v11 }
   0xd   :  { %268 = vmatpush.msra.mxu3 %v224_v53  ;;  %234 = vmatpush.msra.mxu2 %v223_v54 }
   0xe   :  { %124 = vmatpush.msra.mxu0 %v96_v13 }
   0xf   :  { %265 = vmatmul.msk.f32.gmra.mxu1 %vm133_vm1, %v30_v2  ;;  %269 = vmatpush.msra.mxu3 %v223_v54  ;;  %v286_v2 = vld [vmem:[%s459_s5] ss:$0 sm:$0xff] }
  0x10   :  { %125 = vmatpush.msra.mxu0 %v95_v16  ;;  %235 = vmatpush.msra.mxu2 %v222_v55 }
  0x11   :  { %270 = vmatpush.msra.mxu3 %v222_v55 }
  0x12   :  { %236 = vmatpush.msra.mxu2 %v221_v56 }
  0x13   :  { %271 = vmatpush.msra.mxu3 %v221_v56 }
  0x14   :  { %237 = vmatpush.msra.mxu2 %v220_v57 }
  0x15   :  { %272 = vmatpush.msra.mxu3 %v220_v57 }
  0x16   :  { %238 = vmatpush.msra.mxu2 %v219_v58 }
  0x17   :  { %273 = vmatpush.msra.mxu3 %v219_v58 }
  0x18   :  { %239 = vmatpush.msra.mxu2 %v218_v59 }
  0x19   :  { %274 = vmatpush.msra.mxu3 %v218_v59 }
  0x1a   :  { %240 = vmatpush.msra.mxu2 %v217_v60 }
  0x1b   :  { %275 = vmatpush.msra.mxu3 %v217_v60 }
  0x1c   :  { %241 = vmatpush.msra.mxu2 %v216_v61 }
  0x1d   :  { %276 = vmatpush.msra.mxu3 %v216_v61 }
  0x1e   :  { %242 = vmatpush.msra.mxu2 %v215_v62 }
  0x1f   :  { %277 = vmatpush.msra.mxu3 %v215_v62 }
  0x20   :  { %243 = vmatpush.msra.mxu2 %v214_v63 }
  0x21   :  { %278 = vmatpush.msra.mxu3 %v214_v63 }
  0x22   :  { %244 = vmatpush.msra.mxu2 %v213_v1 }
  0x23   :  { %279 = vmatpush.msra.mxu3 %v213_v1 }
  0x24   :  { %245 = vmatpush.msra.mxu2 %v212_v3 }
  0x25   :  { %280 = vmatpush.msra.mxu3 %v212_v3 }
  0x26   :  { %246 = vmatpush.msra.mxu2 %v211_v6 }
  0x27   :  { %281 = vmatpush.msra.mxu3 %v211_v6 }
  0x74   :  { %v35_v14 = vpop.permute.xlu0 %34 }
  0x75   :  { %v45_v15 = vmul.f32 %v284_v10, %v35_v14 }
  0x77   :  { %v51_v17 = vadd.f32 %v285_v12, %v45_v15 }
  0x79   :  { %v53_v18 = vsub.f32 0.0, %v51_v17 }
  0x7b   :  { %v55_v19 = vmul.f32 1.442695, %v53_v18 }
  0x7c   :  { %v40_v20 = vpop.permute.xlu0 %39 }
  0x7d   :  { %288 = vpow2.f32 %v55_v19  ;;  %v46_v21 = vmul.f32 %v284_v10, %v40_v20 }
  0x7f   :  { %v52_v22 = vadd.f32 %v285_v12, %v46_v21 }
  0x81   :  { %v54_v23 = vsub.f32 0.0, %v52_v22 }
  0x83   :  { %v289_v24 = vpop.eup %288  ;;  %v57_v25 = vmul.f32 1.442695, %v54_v23 }
  0x84   :  { %v59_v26 = vadd.f32 1.0, %v289_v24  ;;  %v159_v0 = vpop.f32.mrf.mxu1 }
  0x85   :  { %290 = vpow2.f32 %v57_v25 }
  0x86   :  { %292 = vrcp.f32 %v59_v26  ;;  %v72_v32 = vand.u32 2147483648, %v59_v26  ;;  %v70_v34 = vand.u32 2147483647, %v59_v26  ;;  %vm66_vm3 = vweird.f32 %v59_v26 }
  0x88   :  { %v73_v37 = vor.u32 1.1754944e-38, %v72_v32  ;;  %vm71_vm5 = vcmp.eq.f32.partialorder %v70_v34, 8.507059e+37 }
  0x8b   :  { %v291_v27 = vpop.eup %290 }
  0x8c   :  { %v293_v28 = vpop.eup %292  ;;  %v60_v29 = vadd.f32 1.0, %v291_v27  ;;  %v162_v9 = vpop.f32.mrf.mxu1 }
  0x8d   :  { %v62_v30 = vmul.f32 %v293_v28, %v59_v26  ;;  %vm67_vm2 = vweird.f32 %v293_v28 }
  0x8e   :  { %294 = vrcp.f32 %v60_v29  ;;  %vm68_vm4 = vmor %vm66_vm3, %vm67_vm2  ;;  %v87_v43 = vand.u32 2147483648, %v60_v29  ;;  %v85_v45 = vand.u32 2147483647, %v60_v29  ;;  %vm81_vm8 = vweird.f32 %v60_v29 }
  0x8f   :  { %v63_v31 = vsub.f32 1.0, %v62_v30  ;;  %vm254_vm3 = vcmask 64512  }
  0x90   :  { %v88_v47 = vor.u32 1.1754944e-38, %v87_v43  ;;  %vm86_vm10 = vcmp.eq.f32.partialorder %v85_v45, 8.507059e+37 }
  0x91   :  { %v64_v33 = vmul.f32 %v293_v28, %v63_v31 }
  0x93   :  { %v65_v35 = vadd.f32 %v293_v28, %v64_v33 }
  0x94   :  { %v295_v36 = vpop.eup %294 }
  0x95   :  { %v69_v38 = vsel %vm68_vm4, %v293_v28, %v65_v35  ;;  %v77_v39 = vmul.f32 %v295_v36, %v60_v29  ;;  %vm82_vm7 = vweird.f32 %v295_v36 }
  0x96   :  { %v74_v40 = vsel %vm71_vm5, %v73_v37, %v69_v38  ;;  %vm83_vm9 = vmor %vm81_vm8, %vm82_vm7 }
  0x97   :  { %v91_v41 = vmul.f32 %v74_v40, %v51_v17  ;;  %v78_v42 = vsub.f32 1.0, %v77_v39 }
  0x99   :  { %261 = vmatmul.msk.f32.vlgmr.msra.gmra.mxu0 %vm103_vm6, %v91_v41  ;;  %v79_v44 = vmul.f32 %v295_v36, %v78_v42  ;;  %v287_v42 = vld [vmem:[%s460_s7] ss:$0 sm:$0xff] }
  0x9b   :  { %v80_v46 = vadd.f32 %v295_v36, %v79_v44 }
  0x9d   :  { %v84_v48 = vsel %vm83_vm9, %v295_v36, %v80_v46 }
  0x9e   :  { %v89_v49 = vsel %vm86_vm10, %v88_v47, %v84_v48 }
  0x9f   :  { %v92_v50 = vmul.f32 %v89_v49, %v52_v22 }
  0xa1   :  { %262 = vmatmul.msk.f32.gmra.mxu0 %vm103_vm6, %v92_v50 }
 0x116   :  { %v127_v4 = vpop.f32.mrf.mxu0 }
 0x117   :  { %v160_v5 = vadd.f32 %v159_v0, %v127_v4 }
 0x119   :  { %v169_v7 = vadd.f32 %v286_v2, %v160_v5 }
 0x11b   :  { %v171_v8 = vsub.f32 0.0, %v169_v7 }
 0x11d   :  { %v173_v10 = vmul.f32 1.442695, %v171_v8 }
 0x11e   :  { %v130_v11 = vpop.f32.mrf.mxu0 }
 0x11f   :  { %296 = vpow2.f32 %v173_v10  ;;  %v163_v12 = vadd.f32 %v162_v9, %v130_v11 }
 0x121   :  { %v170_v13 = vadd.f32 %v286_v2, %v163_v12 }
 0x123   :  { %v172_v14 = vsub.f32 0.0, %v170_v13 }
 0x125   :  { %v297_v15 = vpop.eup %296  ;;  %v175_v16 = vmul.f32 1.442695, %v172_v14 }
 0x126   :  { %v177_v17 = vadd.f32 1.0, %v297_v15 }
 0x127   :  { %298 = vpow2.f32 %v175_v16 }
 0x128   :  { %300 = vrcp.f32 %v177_v17  ;;  %v190_v23 = vand.u32 2147483648, %v177_v17  ;;  %v188_v25 = vand.u32 2147483647, %v177_v17  ;;  %vm184_vm12 = vweird.f32 %v177_v17 }
 0x12a   :  { %v191_v28 = vor.u32 1.1754944e-38, %v190_v23  ;;  %vm189_vm14 = vcmp.eq.f32.partialorder %v188_v25, 8.507059e+37 }
 0x12d   :  { %v299_v18 = vpop.eup %298 }
 0x12e   :  { %v301_v19 = vpop.eup %300  ;;  %v178_v20 = vadd.f32 1.0, %v299_v18 }
 0x12f   :  { %v180_v21 = vmul.f32 %v301_v19, %v177_v17  ;;  %vm185_vm11 = vweird.f32 %v301_v19 }
 0x130   :  { %302 = vrcp.f32 %v178_v20  ;;  %vm186_vm13 = vmor %vm184_vm12, %vm185_vm11  ;;  %v205_v34 = vand.u32 2147483648, %v178_v20  ;;  %v203_v36 = vand.u32 2147483647, %v178_v20  ;;  %vm199_vm0 = vweird.f32 %v178_v20 }
 0x131   :  { %v181_v22 = vsub.f32 1.0, %v180_v21 }
 0x132   :  { %v206_v38 = vor.u32 1.1754944e-38, %v205_v34  ;;  %vm204_vm2 = vcmp.eq.f32.partialorder %v203_v36, 8.507059e+37 }
 0x133   :  { %v182_v24 = vmul.f32 %v301_v19, %v181_v22 }
 0x135   :  { %v183_v26 = vadd.f32 %v301_v19, %v182_v24 }
 0x136   :  { %v303_v27 = vpop.eup %302 }
 0x137   :  { %v187_v29 = vsel %vm186_vm13, %v301_v19, %v183_v26  ;;  %v195_v30 = vmul.f32 %v303_v27, %v178_v20  ;;  %vm200_vm15 = vweird.f32 %v303_v27 }
 0x138   :  { %v192_v31 = vsel %vm189_vm14, %v191_v28, %v187_v29  ;;  %vm201_vm1 = vmor %vm199_vm0, %vm200_vm15 }
 0x139   :  { %v209_v32 = vmul.f32 %v192_v31, %v169_v7  ;;  %v196_v33 = vsub.f32 1.0, %v195_v30 }
 0x13b   :  { %247 = vmatmul.f32.vlgmr.msra.gmra.mxu2 %v209_v32  ;;  %v197_v35 = vmul.f32 %v303_v27, %v196_v33 }
 0x13d   :  { %v198_v37 = vadd.f32 %v303_v27, %v197_v35 }
 0x13f   :  { %v202_v39 = vsel %vm201_vm1, %v303_v27, %v198_v37 }
 0x140   :  { %v207_v40 = vsel %vm204_vm2, %v206_v38, %v202_v39 }
 0x141   :  { %v210_v41 = vmul.f32 %v207_v40, %v170_v13 }
 0x143   :  { %250 = vmatmul.f32.vlgmr.msra.gmra.mxu3 %v210_v41 }
 0x1be   :  { %v248_v43 = vpop.f32.mrf.mxu2 }
 0x1bf   :  { %v249_v44 = vadd.f32 %v287_v42, %v248_v43 }
 0x1c1   :  { %255 = vst.msk [vmem:[%s462_s8] sm:$0xff] %vm254_vm3, %v249_v44 }
 0x1c6   :  { %v251_v45 = vpop.f32.mrf.mxu3 }
 0x1c7   :  { %v252_v46 = vadd.f32 %v287_v42, %v251_v45 }
 0x1c9   :  { %256 = vst.msk [vmem:[%s462_s8 + $0x8] sm:$0xff] %vm254_vm3, %v252_v46 }

</bundles_post_ra>
